<compile_context>
chip_gen: v7x
topology: tpu7x:2x2x1
jax: 0.10.0
libtpu: 0.0.40
codegen_flags: <defaults>
</compile_context>

<pallas_src>
import functools

import jax
import jax.numpy as jnp
from jax import lax
from jax.experimental import pallas as pl
from jax.experimental.pallas import tpu as pltpu

_LANE = 128


def _round_up(v, m):
    return (v + m - 1) // m * m


def _downsample_kernel(x_ref, xh_ref, w_ref, b_ref, o_ref):
    """One (batch, row-tile, cout-tile) grid step.

    x_ref  : (1, TH, Ws, 4C) bf16  space-to-depth rows [t*TH, t*TH+TH)
    xh_ref : (1, 1,  Ws, 4C) bf16  halo row t*TH+TH
    w_ref  : (4, 4C, TC)     bf16  packed per-(qh,qw) tap weights
    b_ref  : (1, TC)         f32   lane-padded bias
    o_ref  : (1, TH, Wo, TC) f32   output tile
    """
    th, wo, tc = o_ref.shape[1], o_ref.shape[2], o_ref.shape[3]
    c = x_ref.shape[3] // 4
    lane_aligned = (c % _LANE) == 0

    # rows [0, TH] of the space-to-depth input needed by this output row tile
    xa = jnp.concatenate([x_ref[0], xh_ref[0]], axis=0)        # (TH+1, Ws, 4C)

    # (qh, qw, lane_lo, lane_len): one MXU matmul per 2x2-block offset.
    groups = ((0, 0, 0, 4 * c), (0, 1, c, 2 * c), (1, 0, 0, 2 * c), (1, 1, c, c))

    acc = jnp.zeros((th, wo, tc), jnp.float32)
    for g, (qh, qw, lo, kl) in enumerate(groups):
        if not lane_aligned:
            # small / ragged C: skip lane slicing; the zero rows in the packed
            # weight make the full-4C contraction equivalent.
            lo, kl = 0, 4 * c
        patch = xa[qh:qh + th, qw:qw + wo, lo:lo + kl]         # (TH, Wo, kl)
        wg = w_ref[g, lo:lo + kl, :]                           # (kl, TC)
        acc += lax.dot_general(
            patch, wg,
            dimension_numbers=(((2,), (0,)), ((), ())),
            preferred_element_type=jnp.float32)

    o_ref[0] = (acc + b_ref[0]).astype(o_ref.dtype)


@functools.partial(jax.jit, static_argnames=("th_target",))
def downsample(x_nchw, weight_oihw, bias, th_target=8):
    """x_nchw: (N,C,H,W); weight_oihw: (C,C,3,3); bias: (C,) -> (N,C,Ho,Wo)."""
    n, c, h, w = x_nchw.shape
    ho = (h + 1 - 3) // 2 + 1
    wo = (w + 1 - 3) // 2 + 1
    cdt = jnp.bfloat16

    # ---- single fused glue op: transpose + pad + space-to-depth + bf16 ----
    x_nhwc = jnp.transpose(x_nchw, (0, 2, 3, 1)).astype(cdt)
    hp = _round_up(h + 1, 2)      # asymmetric bottom pad by 1, then to even
    wpd = _round_up(w + 1, 2)     # asymmetric right  pad by 1, then to even
    x_pad = jnp.pad(x_nhwc, ((0, 0), (0, hp - h), (0, wpd - w), (0, 0)))
    hs, ws = hp // 2, wpd // 2
    x5 = x_pad.reshape(n, hs, 2, ws, 2, c)
    # lane-block order [(ph,pw)] = [(0,1), (0,0), (1,0), (1,1)] so each
    # (qh,qw) tap group is a contiguous lane range.
    x_s2d = jnp.concatenate(
        [x5[:, :, 0, :, 1, :], x5[:, :, 0, :, 0, :],
         x5[:, :, 1, :, 0, :], x5[:, :, 1, :, 1, :]], axis=-1)  # (N,Hs,Ws,4C)

    # ---- packed weights: 4 groups, each a (4C, Cp) matrix ----
    cp = max(_LANE, _round_up(c, _LANE))                        # lane-dense C_out
    w_hwio = jnp.transpose(weight_oihw, (2, 3, 1, 0)).astype(cdt)  # (3,3,Cin,Cout)
    lane_of = {(0, 1): 0, (0, 0): 1, (1, 0): 2, (1, 1): 3}
    w_pack = jnp.zeros((4, 4 * c, cp), cdt)
    for kh in range(3):
        for kw in range(3):
            g = 2 * (kh // 2) + (kw // 2)
            l = lane_of[(kh % 2, kw % 2)]
            w_pack = w_pack.at[g, l * c:(l + 1) * c, :c].set(w_hwio[kh, kw])
    b2d = jnp.zeros((1, cp), jnp.float32).at[0, :c].set(bias.astype(jnp.float32))

    # ---- tiling ----
    th = min(th_target, ho)                    # output rows per tile
    grid_t = -(-ho // th)
    ho_pad = grid_t * th                       # dense (unmasked) output stores
    tc = cp if cp <= 512 else (256 if cp % 256 == 0 else _LANE)
    grid_co = cp // tc
    c4 = 4 * c

    out = pl.pallas_call(
        _downsample_kernel,
        out_shape=jax.ShapeDtypeStruct((n, ho_pad, wo, cp), jnp.float32),
        grid_spec=pltpu.PrefetchScalarGridSpec(
            num_scalar_prefetch=0,
            grid=(n, grid_t, grid_co),
            in_specs=[
                pl.BlockSpec((1, th, ws, c4), lambda b, t, co: (b, t, 0, 0)),
                pl.BlockSpec((1, 1, ws, c4),
                             lambda b, t, co: (b, jnp.minimum((t + 1) * th, hs - 1), 0, 0)),
                pl.BlockSpec((4, c4, tc), lambda b, t, co: (0, 0, co)),
                pl.BlockSpec((1, tc), lambda b, t, co: (0, co)),
            ],
            out_specs=pl.BlockSpec((1, th, wo, tc), lambda b, t, co: (b, t, 0, co)),
        ),
        compiler_params=pltpu.CompilerParams(
            dimension_semantics=("parallel", "parallel", "parallel"),
            vmem_limit_bytes=48 * 1024 * 1024,
        ),
    )(x_s2d, x_s2d, w_pack, b2d)

    out = out[:, :ho, :, :c]                   # strip row / lane padding
    return jnp.transpose(out, (0, 3, 1, 2))    # back to NCHW to match PyTorch


if __name__ == "__main__":
    key = jax.random.PRNGKey(0)
    k_x, k_w, k_b = jax.random.split(key, 3)

    N, C, H, W = 2, 4, 16, 16
    x = jax.random.normal(k_x, (N, C, H, W), dtype=jnp.float32)
    weight = jax.random.normal(k_w, (C, C, 3, 3), dtype=jnp.float32) * 0.1
    bias = jax.random.normal(k_b, (C,), dtype=jnp.float32) * 0.1

    out = downsample(x, weight, bias)
    out = jax.block_until_ready(out)

    # reference: same bf16-quantised operands, asymmetric pad + valid stride-2 conv
    xq = x.astype(jnp.bfloat16).astype(jnp.float32)
    wq = weight.astype(jnp.bfloat16).astype(jnp.float32)
    x_ref_pad = jnp.pad(xq, ((0, 0), (0, 0), (0, 1), (0, 1)))
    ref = lax.conv_general_dilated(
        x_ref_pad, wq, window_strides=(2, 2), padding="VALID",
        dimension_numbers=("NCHW", "OIHW", "NCHW"),
        preferred_element_type=jnp.float32,
    ) + bias[None, :, None, None]

    Ho = (H + 1 - 3) // 2 + 1
    Wo = (W + 1 - 3) // 2 + 1
    assert out.shape == (N, C, Ho, Wo), out.shape
    err = float(jnp.max(jnp.abs(out - ref)))
    assert jnp.allclose(out, ref, atol=1e-3, rtol=1e-3), err
    print("KERNEL_OK")
</pallas_src>

<mosaic_0001>
module attributes {stable_mosaic.version = 11 : i64} {
  func.func @_downsample_kernel(%arg0: i32, %arg1: i32, %arg2: i32, %arg3: memref<1x8x9x16xbf16, #tpu.memory_space<vmem>>, %arg4: memref<1x1x9x16xbf16, #tpu.memory_space<vmem>>, %arg5: memref<4x16x128xbf16, #tpu.memory_space<vmem>>, %arg6: memref<1x128xf32, #tpu.memory_space<vmem>>, %arg7: memref<1x8x8x128xf32, #tpu.memory_space<vmem>>) attributes {dimension_semantics = [#tpu.dimension_semantics<parallel>, #tpu.dimension_semantics<parallel>, #tpu.dimension_semantics<parallel>], iteration_bounds = array<i64: 2, 1, 1>, scalar_prefetch = 0 : i64, scratch_operands = 0 : i64, tpu.core_type = #tpu.core_type<tc>, window_params = [{transform_indices = @transform_0, window_bounds = array<i64: 1, 8, 9, 16>}, {transform_indices = @transform_1, window_bounds = array<i64: 1, 1, 9, 16>}, {transform_indices = @transform_2, window_bounds = array<i64: 4, 16, 128>}, {transform_indices = @transform_3, window_bounds = array<i64: 1, 128>}, {transform_indices = @transform_4, window_bounds = array<i64: 1, 8, 8, 128>}]} {
    %c0 = arith.constant 0 : index
    %c0_0 = arith.constant 0 : index
    %c0_1 = arith.constant 0 : index
    %c0_2 = arith.constant 0 : index
    %0 = vector.load %arg3[%c0, %c0_0, %c0_1, %c0_2] : memref<1x8x9x16xbf16, #tpu.memory_space<vmem>>, vector<1x8x9x16xbf16>
    %1 = vector.shape_cast %0 : vector<1x8x9x16xbf16> to vector<8x9x16xbf16>
    %c0_3 = arith.constant 0 : index
    %c0_4 = arith.constant 0 : index
    %c0_5 = arith.constant 0 : index
    %c0_6 = arith.constant 0 : index
    %2 = vector.load %arg4[%c0_3, %c0_4, %c0_5, %c0_6] : memref<1x1x9x16xbf16, #tpu.memory_space<vmem>>, vector<1x1x9x16xbf16>
    %3 = vector.shape_cast %2 : vector<1x1x9x16xbf16> to vector<1x9x16xbf16>
    %4 = tpu.concatenate %1, %3 in 0 : vector<8x9x16xbf16>, vector<1x9x16xbf16> -> vector<9x9x16xbf16>
    %cst = arith.constant 0.000000e+00 : f32
    %5 = vector.broadcast %cst : f32 to vector<8x8x128xf32>
    %6 = vector.extract_strided_slice %4 {offsets = [0, 0, 0], sizes = [8, 8, 16], strides = [1, 1, 1]} : vector<9x9x16xbf16> to vector<8x8x16xbf16>
    %c0_7 = arith.constant 0 : index
    %c0_8 = arith.constant 0 : index
    %c0_9 = arith.constant 0 : index
    %7 = vector.load %arg5[%c0_7, %c0_8, %c0_9] : memref<4x16x128xbf16, #tpu.memory_space<vmem>>, vector<1x16x128xbf16>
    %8 = vector.shape_cast %7 : vector<1x16x128xbf16> to vector<16x128xbf16>
    %cst_10 = arith.constant dense<0.000000e+00> : vector<8x8x128xf32>
    %9 = tpu.matmul %6, %8, %cst_10 {dimension_numbers = #tpu.dot_dimension_numbers<[2], [0], [0, 1], [1], [0, 0, 0, 1, 1, 1], [], []>} : vector<8x8x16xbf16>, vector<16x128xbf16>, vector<8x8x128xf32> -> vector<8x8x128xf32>
    %10 = arith.addf %5, %9 : vector<8x8x128xf32>
    %11 = vector.extract_strided_slice %4 {offsets = [0, 1, 0], sizes = [8, 8, 16], strides = [1, 1, 1]} : vector<9x9x16xbf16> to vector<8x8x16xbf16>
    %c1 = arith.constant 1 : index
    %c0_11 = arith.constant 0 : index
    %c0_12 = arith.constant 0 : index
    %12 = vector.load %arg5[%c1, %c0_11, %c0_12] : memref<4x16x128xbf16, #tpu.memory_space<vmem>>, vector<1x16x128xbf16>
    %13 = vector.shape_cast %12 : vector<1x16x128xbf16> to vector<16x128xbf16>
    %cst_13 = arith.constant dense<0.000000e+00> : vector<8x8x128xf32>
    %14 = tpu.matmul %11, %13, %cst_13 {dimension_numbers = #tpu.dot_dimension_numbers<[2], [0], [0, 1], [1], [0, 0, 0, 1, 1, 1], [], []>} : vector<8x8x16xbf16>, vector<16x128xbf16>, vector<8x8x128xf32> -> vector<8x8x128xf32>
    %15 = arith.addf %10, %14 : vector<8x8x128xf32>
    %16 = vector.extract_strided_slice %4 {offsets = [1, 0, 0], sizes = [8, 8, 16], strides = [1, 1, 1]} : vector<9x9x16xbf16> to vector<8x8x16xbf16>
    %c2 = arith.constant 2 : index
    %c0_14 = arith.constant 0 : index
    %c0_15 = arith.constant 0 : index
    %17 = vector.load %arg5[%c2, %c0_14, %c0_15] : memref<4x16x128xbf16, #tpu.memory_space<vmem>>, vector<1x16x128xbf16>
    %18 = vector.shape_cast %17 : vector<1x16x128xbf16> to vector<16x128xbf16>
    %cst_16 = arith.constant dense<0.000000e+00> : vector<8x8x128xf32>
    %19 = tpu.matmul %16, %18, %cst_16 {dimension_numbers = #tpu.dot_dimension_numbers<[2], [0], [0, 1], [1], [0, 0, 0, 1, 1, 1], [], []>} : vector<8x8x16xbf16>, vector<16x128xbf16>, vector<8x8x128xf32> -> vector<8x8x128xf32>
    %20 = arith.addf %15, %19 : vector<8x8x128xf32>
    %21 = vector.extract_strided_slice %4 {offsets = [1, 1, 0], sizes = [8, 8, 16], strides = [1, 1, 1]} : vector<9x9x16xbf16> to vector<8x8x16xbf16>
    %c3 = arith.constant 3 : index
    %c0_17 = arith.constant 0 : index
    %c0_18 = arith.constant 0 : index
    %22 = vector.load %arg5[%c3, %c0_17, %c0_18] : memref<4x16x128xbf16, #tpu.memory_space<vmem>>, vector<1x16x128xbf16>
    %23 = vector.shape_cast %22 : vector<1x16x128xbf16> to vector<16x128xbf16>
    %cst_19 = arith.constant dense<0.000000e+00> : vector<8x8x128xf32>
    %24 = tpu.matmul %21, %23, %cst_19 {dimension_numbers = #tpu.dot_dimension_numbers<[2], [0], [0, 1], [1], [0, 0, 0, 1, 1, 1], [], []>} : vector<8x8x16xbf16>, vector<16x128xbf16>, vector<8x8x128xf32> -> vector<8x8x128xf32>
    %25 = arith.addf %20, %24 : vector<8x8x128xf32>
    %c0_20 = arith.constant 0 : index
    %c0_21 = arith.constant 0 : index
    %26 = vector.load %arg6[%c0_20, %c0_21] : memref<1x128xf32, #tpu.memory_space<vmem>>, vector<1x128xf32>
    %27 = vector.shape_cast %26 : vector<1x128xf32> to vector<128xf32>
    %28 = vector.shape_cast %27 : vector<128xf32> to vector<1x1x128xf32>
    %29 = vector.broadcast %28 : vector<1x1x128xf32> to vector<8x8x128xf32>
    %30 = arith.addf %25, %29 : vector<8x8x128xf32>
    %c0_22 = arith.constant 0 : index
    %c0_23 = arith.constant 0 : index
    %c0_24 = arith.constant 0 : index
    %c0_25 = arith.constant 0 : index
    %31 = vector.load %arg7[%c0_22, %c0_23, %c0_24, %c0_25] : memref<1x8x8x128xf32, #tpu.memory_space<vmem>>, vector<1x8x8x128xf32>
    %32 = vector.shape_cast %31 : vector<1x8x8x128xf32> to vector<8x8x128xf32>
    %33 = vector.shape_cast %30 : vector<8x8x128xf32> to vector<1x8x8x128xf32>
    tpu.vector_store %arg7[%c0_22, %c0_23, %c0_24, %c0_25], %33 {strides = array<i32>} : memref<1x8x8x128xf32, #tpu.memory_space<vmem>>, vector<1x8x8x128xf32>,
    return
  }
  func.func @transform_0(%arg0: i32, %arg1: i32, %arg2: i32) -> (i32, i32, i32, i32) {
    %c0_i32 = arith.constant 0 : i32
    %c0_i32_0 = arith.constant 0 : i32
    %c0_i32_1 = arith.constant 0 : i32
    return %arg0, %arg1, %c0_i32, %c0_i32_0 : i32, i32, i32, i32
  }
  func.func @transform_1(%arg0: i32, %arg1: i32, %arg2: i32) -> (i32, i32, i32, i32) {
    %c1_i32 = arith.constant 1 : i32
    %0 = arith.addi %arg1, %c1_i32 : i32
    %c8_i32 = arith.constant 8 : i32
    %1 = arith.muli %0, %c8_i32 : i32
    %c8_i32_0 = arith.constant 8 : i32
    %2 = arith.minsi %1, %c8_i32_0 : i32
    %c0_i32 = arith.constant 0 : i32
    %c0_i32_1 = arith.constant 0 : i32
    %c0_i32_2 = arith.constant 0 : i32
    return %arg0, %2, %c0_i32, %c0_i32_1 : i32, i32, i32, i32
  }
  func.func @transform_2(%arg0: i32, %arg1: i32, %arg2: i32) -> (i32, i32, i32) {
    %c0_i32 = arith.constant 0 : i32
    %c0_i32_0 = arith.constant 0 : i32
    %c0_i32_1 = arith.constant 0 : i32
    return %c0_i32, %c0_i32_0, %arg2 : i32, i32, i32
  }
  func.func @transform_3(%arg0: i32, %arg1: i32, %arg2: i32) -> (i32, i32) {
    %c0_i32 = arith.constant 0 : i32
    %c0_i32_0 = arith.constant 0 : i32
    return %c0_i32, %arg2 : i32, i32
  }
  func.func @transform_4(%arg0: i32, %arg1: i32, %arg2: i32) -> (i32, i32, i32, i32) {
    %c0_i32 = arith.constant 0 : i32
    %c0_i32_0 = arith.constant 0 : i32
    return %arg0, %arg1, %c0_i32, %arg2 : i32, i32, i32, i32
  }
}

</mosaic_0001>

<bundles_post_ra>
// kernel: downsample.1
= control target key start
LH: loop header
LB: loop body
LE: loop exit
PB: predicated region body
PF: predicated region fallthrough
CT: control target
= control target key end

     0   :  { %s1328_s15 = smov 0   ;;  %s1330_s16 = smov 0   ;;  %s1504_s0 = inlined_call_operand.vmem [shape: bf16[2,9,9,16], index: 0, kind: input, shape index: {}, may-alias: {0,1}]   ;;  %s1505_s1 = inlined_call_operand.vmem [shape: bf16[2,9,9,16], index: 1, kind: input, shape index: {}, may-alias: {0,1}]   ;;  %s1506_s2 = inlined_call_operand.vmem [shape: bf16[4,16,128], index: 2, kind: input, shape index: {}]   ;;  %s1507_s3 = inlined_call_operand.vmem [shape: f32[1,128], index: 3, kind: input, shape index: {}]   ;;  %s1508_s4 = inlined_call_operand.vmem [shape: f32[2,8,8,128], index: 4, kind: output, shape index: {}]  }
   0x1   :  { %s1332_s17 = smov 0  }
   0x2 LB: > { %s33_s18 = sadd.s32 1, %s1297_s16  ;;  %p1104_p0 = scmp.ge.s32.totalorder %s1301_s17, 1  ;;  %s1301_s17 = sphi %s1332_s17, %s14_s17   ;;  %s1297_s16 = sphi %s1330_s16, %s1512_s16   ;;  %s1293_s15 = sphi %s1328_s15, %s1511_s15  }
   0x3   : > { %p35_p1 = scmp.ge.s32.totalorder %s33_s18, 2  ;;  %p252_p2 = scmp.lt.s32.totalorder %s1301_s17, 3 }
   0x5   : > { %s1514_s18 = smov (%p35_p1, %s33_s18), 0  ;;  %p253_p3 = pnand %p1104_p0, %p252_p2 }
   0x6   : > { %v1268_v0 = vld [vmem:[%s1506_s2 + $0x10] sm:$0xff] (!%p253_p3)   ;;  %p321_p4 = scmp.lt.s32.totalorder (!%p253_p3), %s1293_s15, 1  ;;  %v1272_v1 = vld [vmem:[%s1506_s2 + $0x8] sm:$0xff] (!%p253_p3)   ;;  %v1357_v2 = vld [vmem:[%s1506_s2] sm:$0xff] (!%p253_p3)   ;;  %vm530_vm0 = vcmask (!%p253_p3), 130048  }
   0x7   : > { %256 = sbr.rel (%p253_p3) target bundleno = 282 (0x11a), region = 36  ;;  %1197 = vmatprep.subr.bf16.mxu0 (!%p253_p3), %v1268_v0  ;;  %1177 = vmatprep.subr.bf16.mxu1 (!%p253_p3), %v1272_v1  ;;  %v1275_v3 = vld [vmem:[%s1506_s2 + $0x18] sm:$0xff] (!%p253_p3)   ;;  %vm397_vm1 = vsmask.f32 (!%p253_p3), 3328  ;;  %vm398_vm2 = vsmask.f32 (!%p253_p3), 7440 }
   0x8   : > { %1198 = vmatpush3.bf16.msra.mxu0 (!%p253_p3), %v1268_v0  ;;  %1178 = vmatpush3.bf16.msra.mxu1 (!%p253_p3), %v1272_v1  ;;  %vm1422_vm3 = vmor (!%p253_p3), %vm397_vm1, %vm398_vm2 }
   0x9   : > { %1187 = vmatprep.subr.bf16.mxu1 (!%p253_p3), %v1357_v2  ;;  %1207 = vmatprep.subr.bf16.mxu0 (!%p253_p3), %v1275_v3 }
   0xe   : > { %s1516_s15 = smov (!%p321_p4, %s1293_s15), 1 }
   0xf   : > { %s1241_s25 = smul.u32 72, %s1516_s15  ;;  %s1156_s9 = sshll.u32 %s1516_s15, 6 }
  0x10   : > { %s371_s14 = scalar_lea.vmem %s1508_s4, %s1156_s9 }
  0x11   : > { %s1369_s30 = scalar_lea.vmem %s1504_s0, %s1241_s25  ;;  %s1155_s5 = sadd.s32 64, %s1241_s25 }
  0x12   : > { %v1372_v4 = vld [vmem:[%s1369_s30 + $0x8] sm:$0xf]  ;;  %v1375_v5 = vld [vmem:[%s1369_s30 + $0x10] sm:$0xf]  ;;  %v1378_v6 = vld [vmem:[%s1369_s30 + $0x18] sm:$0xf]  ;;  %s348_s8 = scalar_lea.vmem %s1505_s1, %s1155_s5 }
  0x13   : > { %v429_v7 = vshrl.u32 %v1375_v5, 16  ;;  %v432_v8 = vshll.u32 %v1375_v5, 16  ;;  %v1383_v9 = vld [vmem:[%s1369_s30 + $0x20] sm:$0xf]  ;;  %v415_v10 = vshrl.u32 %v1372_v4, 16  ;;  %v418_v11 = vshll.u32 %v1372_v4, 16 }
  0x14   : > { %v1131_v12 = vcombine.low %v1372_v4, %v1375_v5  ;;  %v1390_v13 = vld [vmem:[%s1369_s30 + $0x28] sm:$0xf]  ;;  %v1393_v14 = vld [vmem:[%s1369_s30 + $0x30] sm:$0xf]  ;;  %v457_v17 = vshrl.u32 %v1383_v9, 16  ;;  %v1132_v18 = vcombine.low %v1378_v6, %v1383_v9  ;;  %v460_v20 = vshll.u32 %v1383_v9, 16 }
  0x15   : > { %v431_v15 = vrot.slane %v429_v7, 4  ;;  %v434_v16 = vrot.slane %v432_v8, 5  ;;  %v1399_v19 = vld [vmem:[%s1369_s30] sm:$0xf]  ;;  %v471_v21 = vshrl.u32 %v1390_v13, 16  ;;  %v474_v22 = vshll.u32 %v1390_v13, 16 }
  0x16   : > { %1199 = vmatprep.mubr.msk.bf16.mxu0 %vm530_vm0, %v1131_v12  ;;  %v1133_v23 = vcombine.low %v1390_v13, %v1393_v14  ;;  %v375_v24 = vld [vmem:[%s1369_s30 + $0x4] sm:$0x1]  ;;  %v485_v25 = vshrl.u32 %v1393_v14, 16  ;;  %v488_v26 = vshll.u32 %v1393_v14, 16  ;;  %v377_v27 = vld [vmem:[%s1369_s30 + $0xc] sm:$0x1]  ;;  %v1122_v40 = vcombine.low %v1383_v9, %v1390_v13 }
  0x17   : > { %1200 = vmatmul.mubr.msk.bf16.vlgmr.msra.gmra.mrb[0].mxu0 %vm530_vm0, %v1132_v18  ;;  %v379_v28 = vld [vmem:[%s1369_s30 + $0x14] sm:$0x1]  ;;  %v435_v29 = vor.u32 %v434_v16, %v431_v15  ;;  %v401_v30 = vshrl.u32 %v1399_v19, 16  ;;  %v404_v31 = vshll.u32 %v1399_v19, 16  ;;  %v410_v32 = vshll.u32 %v375_v24, 16 }
  0x18   : > { %1203 = vmatprep.mubr.msk.bf16.mxu0 %vm530_vm0, %v1133_v23  ;;  %v417_v33 = vrot.slane %v415_v10, 4  ;;  %1208 = vmatpush3.bf16.msra.mxu0 %v1275_v3  ;;  %v381_v34 = vld [vmem:[%s1369_s30 + $0x1c] sm:$0x1]  ;;  %v420_v35 = vrot.slane %v418_v11, 5  ;;  %v424_v36 = vshll.u32 %v377_v27, 16  ;;  %v438_v38 = vshll.u32 %v379_v28, 16 }
  0x19   : > { %v436_v37 = vrot.slane %v435_v29, 4  ;;  %v383_v39 = vld [vmem:[%s1369_s30 + $0x24] sm:$0x1]  ;;  %v403_v41 = vrot.slane %v401_v30, 4  ;;  %v406_v42 = vrot.slane %v404_v31, 5  ;;  %v412_v43 = vrot.slane %v410_v32, 5 }
  0x1a   : > { %v443_v44 = vshrl.u32 %v1378_v6, 16  ;;  %v421_v45 = vor.u32 %v420_v35, %v417_v33  ;;  %v426_v46 = vrot.slane %v424_v36, 5  ;;  %v440_v47 = vrot.slane %v438_v38, 5  ;;  %v1432_v49 = vld [vmem:[%s1369_s30 + $0x38] sm:$0xf] }
  0x1b   : > { %v446_v48 = vshll.u32 %v1378_v6, 16  ;;  %v407_v50 = vor.u32 %v406_v42, %v403_v41  ;;  %v452_v52 = vshll.u32 %v381_v34, 16  ;;  %v459_v53 = vrot.slane %v457_v17, 4  ;;  %v390_v58 = vld [vmem:[%s348_s8] sm:$0xf] }
  0x1c   : > { %v445_v51 = vrot.slane %v443_v44, 4  ;;  %v422_v54 = vrot.slane %v421_v45, 4  ;;  %v441_v55 = vsel %vm1422_vm3, %v436_v37, %v440_v47  ;;  %v462_v57 = vrot.slane %v460_v20, 5  ;;  %v391_v3 = vld [vmem:[%s348_s8 + $0x4] sm:$0x1] }
  0x1d   : > { %v448_v56 = vrot.slane %v446_v48, 5  ;;  %v408_v59 = vrot.slane %v407_v50, 4  ;;  %v454_v60 = vrot.slane %v452_v52, 5  ;;  %v466_v61 = vshll.u32 %v383_v39, 16  ;;  %v385_v15 = vld [vmem:[%s1369_s30 + $0x2c] sm:$0x1] }
  0x1e   : > { %v499_v62 = vshrl.u32 %v1432_v49, 16  ;;  %v427_v63 = vsel %vm1422_vm3, %v422_v54, %v426_v46  ;;  %v463_v1 = vor.u32 %v462_v57, %v459_v53  ;;  %v502_v7 = vshll.u32 %v1432_v49, 16  ;;  %v387_v33 = vld [vmem:[%s1369_s30 + $0x34] sm:$0x1]  ;;  %v389_v34 = vld [vmem:[%s1369_s30 + $0x3c] sm:$0x1] }
  0x1f   : > { %v449_v0 = vor.u32 %v448_v56, %v445_v51  ;;  %v413_v8 = vsel %vm1422_vm3, %v408_v59, %v412_v43  ;;  %v468_v10 = vrot.slane %v466_v61, 5  ;;  %v1142_v11 = vcombine.low %v427_v63, %v441_v55  ;;  %v1151_v9 = vld [vmem:[%s1507_s3] ss:$0 sm:$0xff] }
  0x20   : > { %v1134_v12 = vcombine.low %v1432_v49, %v390_v58  ;;  %v464_v17 = vrot.slane %v463_v1, 4  ;;  %v1111_v18 = vcombine.low %v413_v8, %v427_v63  ;;  %v815_v20 = vshrl.u32 %v390_v58, 16 }
  0x21   : > { %v450_v16 = vrot.slane %v449_v0, 4  ;;  %v818_v23 = vshll.u32 %v390_v58, 16  ;;  %v824_v24 = vshll.u32 %v391_v3, 16  ;;  %v473_v27 = vrot.slane %v471_v21, 4 }
  0x22   : > { %1204 = vmatmul.mubr.msk.bf16.gmra.mrb[4].mxu0 %vm530_vm0, %v1134_v12  ;;  %v476_v28 = vrot.slane %v474_v22, 5  ;;  %v469_v30 = vsel %vm1422_vm3, %v464_v17, %v468_v10  ;;  %1179 = vmatprep.mubr.msk.bf16.mxu1 %vm530_vm0, %v1111_v18  ;;  %v817_v31 = vrot.slane %v815_v20, 4  ;;  %v480_v32 = vshll.u32 %v385_v15, 16 }
  0x23   : > { %v455_v29 = vsel %vm1422_vm3, %v450_v16, %v454_v60  ;;  %1209 = vmatprep.mubr.msk.bf16.mxu0 %vm530_vm0, %v1142_v11  ;;  %v820_v21 = vrot.slane %v818_v23, 5  ;;  %v487_v22 = vrot.slane %v485_v25, 4  ;;  %v490_v39 = vrot.slane %v488_v26, 5 }
  0x24   : > { %v1112_v35 = vcombine.low %v441_v55, %v455_v29  ;;  %v1143_v36 = vcombine.low %v455_v29, %v469_v30  ;;  %v477_v37 = vor.u32 %v476_v28, %v473_v27  ;;  %v482_v38 = vrot.slane %v480_v32, 5 }
  0x25   : > { %v494_v41 = vshll.u32 %v387_v33, 16  ;;  %v501_v42 = vrot.slane %v499_v62, 4  ;;  %v504_v43 = vrot.slane %v502_v7, 5  ;;  %v508_v44 = vshll.u32 %v389_v34, 16 }
  0x26   : > { %1180 = vmatmul.mubr.msk.bf16.vlgmr.msra.gmra.mrb[0].mxu1 %vm530_vm0, %v1112_v35  ;;  %v826_v45 = vrot.slane %v824_v24, 5  ;;  %v478_v46 = vrot.slane %v477_v37, 4  ;;  %v491_v47 = vor.u32 %v490_v39, %v487_v22  ;;  %v821_v48 = vor.u32 %v820_v21, %v817_v31 }
  0x27   : > { %1188 = vmatpush3.bf16.msra.mxu1 %v1357_v2  ;;  %v496_v50 = vrot.slane %v494_v41, 5  ;;  %v505_v51 = vor.u32 %v504_v43, %v501_v42  ;;  %v510_v52 = vrot.slane %v508_v44, 5  ;;  %v1120_v59 = vcombine.low %v1399_v19, %v1372_v4 }
  0x28   : > { %v483_v25 = vsel %vm1422_vm3, %v478_v46, %v482_v38  ;;  %v492_v53 = vrot.slane %v491_v47, 4  ;;  %v822_v26 = vrot.slane %v821_v48, 4  ;;  %v1121_v62 = vcombine.low %v1375_v5, %v1378_v6 }
  0x29   : > { %v1113_v54 = vcombine.low %v469_v30, %v483_v25  ;;  %v506_v55 = vrot.slane %v505_v51, 4  ;;  %v1123_v4 = vcombine.low %v1393_v14, %v1432_v49 }
  0x2a   : > { %1210 = vmatmul.mubr.msk.bf16.vlgmr.msra.gmra.mrb[0].mxu0 %vm530_vm0, %v1143_v36  ;;  %v497_v56 = vsel %vm1422_vm3, %v492_v53, %v496_v50  ;;  %v827_v2 = vsel %vm1422_vm3, %v822_v26, %v826_v45 }
  0x2b   : > { %1183 = vmatprep.mubr.msk.bf16.mxu1 %vm530_vm0, %v1113_v54  ;;  %v511_v57 = vsel %vm1422_vm3, %v506_v55, %v510_v52  ;;  %v1144_v58 = vcombine.low %v483_v25, %v497_v56 }
  0x2c   : > { %v1114_v60 = vcombine.low %v497_v56, %v511_v57  ;;  %v1145_v61 = vcombine.low %v511_v57, %v827_v2 }
  0x2d   : > { %1213 = vmatprep.mubr.msk.bf16.mxu0 %vm530_vm0, %v1144_v58 }
  0x2e   : > { %1184 = vmatmul.mubr.msk.bf16.gmra.mrb[4].mxu1 %vm530_vm0, %v1114_v60 }
  0x2f   : > { %1189 = vmatprep.mubr.msk.bf16.mxu1 %vm530_vm0, %v1120_v59 }
  0x32   : > { %1214 = vmatmul.mubr.msk.bf16.gmra.mrb[4].mxu0 %vm530_vm0, %v1145_v61 }
  0x36   : > { %1190 = vmatmul.mubr.msk.bf16.vlgmr.msra.gmra.mrb[0].mxu1 %vm530_vm0, %v1121_v62 }
  0x37   : > { %1193 = vmatprep.mubr.msk.bf16.mxu1 %vm530_vm0, %v1122_v40 }
  0x3e   : > { %1194 = vmatmul.mubr.msk.bf16.gmra.mrb[4].mxu1 %vm530_vm0, %v1123_v4 }
  0xfd   : > { %v1211_v19 = vpop.f32.mrb[0].mxu0 }
  0xfe   : > { %v885_v63 = vpop.f32.mrb[1].mxu0 }
  0xff   : > { %v1212_v0 = vpop.f32.mrb[2].mxu0 }
 0x100   : > { %v888_v1 = vpop.f32.mrb[3].mxu0 }
 0x105   : > { %v1215_v3 = vpop.f32.mrb[4].mxu0 }
 0x106   : > { %v901_v7 = vpop.f32.mrb[5].mxu0 }
 0x107   : > { %v1216_v8 = vpop.f32.mrb[6].mxu0 }
 0x108   : > { %v904_v5 = vpop.f32.mrb[7].mxu0 }
 0x109   : > { %v1191_v6 = vpop.f32.mrb[0].mxu1 }
 0x10a   : > { %v1217_v13 = vadd.f32 %v1211_v19, %v1191_v6  ;;  %v680_v10 = vpop.f32.mrb[1].mxu1 }
 0x10b   : > { %v1218_v14 = vadd.f32 %v885_v63, %v680_v10  ;;  %v1192_v49 = vpop.f32.mrb[2].mxu1 }
 0x10c   : > { %v933_v11 = vadd.f32 %v1217_v13, %v1151_v9  ;;  %v1219_v12 = vadd.f32 %v1212_v0, %v1192_v49  ;;  %v683_v15 = vpop.f32.mrb[3].mxu1 }
 0x10d   : > { %v931_v16 = vadd.f32 %v1218_v14, %v1151_v9  ;;  %v1220_v17 = vadd.f32 %v888_v1, %v683_v15 }
 0x10e   : > { %941 = vst [vmem:[%s371_s14 + $0x10] sm:$0xff] %v933_v11  ;;  %v934_v18 = vadd.f32 %v1219_v12, %v1151_v9 }
 0x10f   : > { %939 = vst [vmem:[%s371_s14] sm:$0xff] %v931_v16  ;;  %v932_v20 = vadd.f32 %v1220_v17, %v1151_v9 }
 0x110   : > { %942 = vst [vmem:[%s371_s14 + $0x18] sm:$0xff] %v934_v18 }
 0x111   : > { %940 = vst [vmem:[%s371_s14 + $0x8] sm:$0xff] %v932_v20  ;;  %v1195_v23 = vpop.f32.mrb[4].mxu1 }
 0x112   : > { %v1221_v24 = vadd.f32 %v1215_v3, %v1195_v23  ;;  %v696_v27 = vpop.f32.mrb[5].mxu1 }
 0x113   : > { %v1222_v28 = vadd.f32 %v901_v7, %v696_v27  ;;  %v1196_v29 = vpop.f32.mrb[6].mxu1 }
 0x114   : > { %v937_v30 = vadd.f32 %v1221_v24, %v1151_v9  ;;  %v1223_v31 = vadd.f32 %v1216_v8, %v1196_v29  ;;  %v699_v32 = vpop.f32.mrb[7].mxu1 }
 0x115   : > { %v935_v33 = vadd.f32 %v1222_v28, %v1151_v9  ;;  %v1224_v34 = vadd.f32 %v904_v5, %v699_v32 }
 0x116   : > { %945 = vst [vmem:[%s371_s14 + $0x30] sm:$0xff] %v937_v30  ;;  %v938_v35 = vadd.f32 %v1223_v31, %v1151_v9 }
 0x117   : > { %943 = vst [vmem:[%s371_s14 + $0x20] sm:$0xff] %v935_v33  ;;  %v936_v36 = vadd.f32 %v1224_v34, %v1151_v9 }
 0x118   : > { %946 = vst [vmem:[%s371_s14 + $0x38] sm:$0xff] %v938_v35 }
 0x119   : > { %944 = vst [vmem:[%s371_s14 + $0x28] sm:$0xff] %v936_v36 }
 0x11a PF: > { %s14_s17 = sadd.s32 1, %s1301_s17   ;;  %s1511_s15 = smov %s1297_s16 }
 0x11b   : > { %p11_p5 = scmp.ge.s32.totalorder %s14_s17, 4   ;;  %s1512_s16 = smov %s1514_s18 }
 0x11d   :  { %13 = sbr.rel (!%p11_p5) target bundleno = 2 (0x2), region = 78 }

</bundles_post_ra>
